<compile_context>
chip_gen: v6e
topology: v6e:2x2x1
jax: 0.10.0
libtpu: 0.0.40
codegen_flags: <defaults>
</compile_context>

<pallas_src>
import functools

import jax
import jax.numpy as jnp
import numpy as np
from jax.experimental import pallas as pl
from jax.experimental.pallas import tpu as pltpu

EPS = 1e-5                      # PyTorch BatchNorm2d default
VMEM_LIMIT = 48 * 1024 * 1024   # explicit scoped-VMEM budget (fits v5e/v6e/v7x)


def _round_up(a, b):
    return (a + b - 1) // b * b


# ----------------------------- Pallas kernels ------------------------------

def _matmul_bn_kernel(apply_relu, x_ref, w_ref, scale_ref, bias_ref, o_ref):
    """y = relu_opt((x @ w) * scale + bias); bf16 operands, f32 accumulate."""
    acc = jnp.dot(x_ref[...], w_ref[...], preferred_element_type=jnp.float32)
    y = acc * scale_ref[...] + bias_ref[...]
    if apply_relu:
        y = jnp.maximum(y, 0.0)
    o_ref[...] = y.astype(o_ref.dtype)


def _fused_conv3_id_kernel(x_ref, w3_ref, s3_ref, b3_ref,
                           xi_ref, wid_ref, sid_ref, bid_ref, o_ref):
    """ReLU( BN3(x @ w3) + BNid(xi @ wid) ): conv3 + identityConv fused."""
    main = jnp.dot(x_ref[...], w3_ref[...], preferred_element_type=jnp.float32)
    iden = jnp.dot(xi_ref[...], wid_ref[...], preferred_element_type=jnp.float32)
    y = (main * s3_ref[...] + b3_ref[...]) + (iden * sid_ref[...] + bid_ref[...])
    o_ref[...] = jnp.maximum(y, 0.0).astype(o_ref.dtype)


def _conv3x3_bn_relu_kernel(stride, Ho, Wo, hs_ref, w_ref, scale_ref, bias_ref,
                            o_ref):
    """3x3 conv as 9 accumulating dots over a phase-split padded input tile.

    hs_ref : (stride*stride, Hph, Wph, C)  phase-split zero-padded input
             (one image): hs[p*s+q, i, j, :] = x_pad[s*i+p, s*j+q, :]
    w_ref  : (9*C, C2) 3x3 weights, row-major tap order (di, dj, c)
    """
    C = hs_ref.shape[-1]
    C2 = w_ref.shape[-1]
    acc = jnp.zeros((Ho * Wo, C2), jnp.float32)
    for di in range(3):
        for dj in range(3):
            phase = (di % stride) * stride + (dj % stride)
            r0, c0 = di // stride, dj // stride
            patch = hs_ref[phase, r0:r0 + Ho, c0:c0 + Wo, :]
            xm = patch.reshape(Ho * Wo, C)
            wm = w_ref[(di * 3 + dj) * C:(di * 3 + dj + 1) * C, :]
            acc = acc + jnp.dot(xm, wm, preferred_element_type=jnp.float32)
    y = acc * scale_ref[...] + bias_ref[...]
    o_ref[...] = jnp.maximum(y, 0.0).astype(o_ref.dtype)


# ------------------------------ kernel wrappers ------------------------------

def matmul_bn_relu(x, w, scale, bias, *, relu, out_dtype, bm=512):
    """Row-tiled (x @ w) * scale + bias [+ ReLU]."""
    M, K = x.shape
    Cout = w.shape[1]
    bm = min(bm, _round_up(M, 8))
    M_pad = _round_up(M, bm)
    if M_pad != M:
        x = jnp.pad(x, ((0, M_pad - M), (0, 0)))
    # TODO(synk): add a K-reduction grid axis (accumulator scratch + pl.when)
    #             for very large K so the weight need not be fully VMEM-resident.
    out = pl.pallas_call(
        functools.partial(_matmul_bn_kernel, relu),
        out_shape=jax.ShapeDtypeStruct((M_pad, Cout), out_dtype),
        grid=(M_pad // bm,),
        in_specs=[
            pl.BlockSpec((bm, K), lambda i: (i, 0)),
            pl.BlockSpec((K, Cout), lambda i: (0, 0)),
            pl.BlockSpec((1, Cout), lambda i: (0, 0)),
            pl.BlockSpec((1, Cout), lambda i: (0, 0)),
        ],
        out_specs=pl.BlockSpec((bm, Cout), lambda i: (i, 0)),
        compiler_params=pltpu.CompilerParams(
            dimension_semantics=("parallel",),
            vmem_limit_bytes=VMEM_LIMIT),
    )(x, w,
      scale.reshape(1, Cout).astype(jnp.float32),
      bias.reshape(1, Cout).astype(jnp.float32))
    return out[:M] if M_pad != M else out


def fused_conv3_identity(h, w3, s3, b3, xi, wid, sid, bid, *, out_dtype, bm=512):
    """One kernel: ReLU( BN3(h @ w3) + BNid(xi @ wid) )."""
    M, K3 = h.shape
    Kid = xi.shape[1]
    Cout = w3.shape[1]
    bm = min(bm, _round_up(M, 8))
    M_pad = _round_up(M, bm)
    if M_pad != M:
        h = jnp.pad(h, ((0, M_pad - M), (0, 0)))
        xi = jnp.pad(xi, ((0, M_pad - M), (0, 0)))
    out = pl.pallas_call(
        _fused_conv3_id_kernel,
        out_shape=jax.ShapeDtypeStruct((M_pad, Cout), out_dtype),
        grid=(M_pad // bm,),
        in_specs=[
            pl.BlockSpec((bm, K3), lambda i: (i, 0)),
            pl.BlockSpec((K3, Cout), lambda i: (0, 0)),
            pl.BlockSpec((1, Cout), lambda i: (0, 0)),
            pl.BlockSpec((1, Cout), lambda i: (0, 0)),
            pl.BlockSpec((bm, Kid), lambda i: (i, 0)),
            pl.BlockSpec((Kid, Cout), lambda i: (0, 0)),
            pl.BlockSpec((1, Cout), lambda i: (0, 0)),
            pl.BlockSpec((1, Cout), lambda i: (0, 0)),
        ],
        out_specs=pl.BlockSpec((bm, Cout), lambda i: (i, 0)),
        compiler_params=pltpu.CompilerParams(
            dimension_semantics=("parallel",),
            vmem_limit_bytes=VMEM_LIMIT),
    )(h, w3,
      s3.reshape(1, Cout).astype(jnp.float32),
      b3.reshape(1, Cout).astype(jnp.float32),
      xi, wid,
      sid.reshape(1, Cout).astype(jnp.float32),
      bid.reshape(1, Cout).astype(jnp.float32))
    return out[:M] if M_pad != M else out


def conv3x3_bn_relu(h_nhwc, w_mat, scale, bias, stride, *, out_dtype):
    """3x3 / pad=1 / stride conv + folded BN + ReLU, no im2col in HBM.

    Returns ((N*Ho*Wo, C2) rows, Ho, Wo)."""
    N, H, W, C = h_nhwc.shape
    C2 = w_mat.shape[1]
    Ho = (H - 1) // stride + 1
    Wo = (W - 1) // stride + 1
    halo = -(-2 // stride)                 # ceil(2 / stride)
    Hph, Wph = Ho + halo, Wo + halo
    # zero-pad: 1 row/col of conv padding plus enough to make the phase split even
    hp = jnp.pad(h_nhwc, ((0, 0),
                          (1, stride * Hph - H - 1),
                          (1, stride * Wph - W - 1),
                          (0, 0)))
    # space-to-depth phase split (cheap reshape+transpose, never 9x-expanded):
    # hs[p*stride+q, n, i, j, :] = hp[n, stride*i+p, stride*j+q, :]
    hs = hp.reshape(N, Hph, stride, Wph, stride, C)
    hs = jnp.transpose(hs, (2, 4, 0, 1, 3, 5)).reshape(
        stride * stride, N, Hph, Wph, C)

    kernel = functools.partial(_conv3x3_bn_relu_kernel, stride, Ho, Wo)
    # TODO(synk): for large spatial extents, add an output-row-block grid axis.
    out = pl.pallas_call(
        kernel,
        out_shape=jax.ShapeDtypeStruct((N * Ho * Wo, C2), out_dtype),
        grid=(N,),
        in_specs=[
            pl.BlockSpec((stride * stride, None, Hph, Wph, C),
                         lambda n: (0, n, 0, 0, 0)),
            pl.BlockSpec((9 * C, C2), lambda n: (0, 0)),
            pl.BlockSpec((1, C2), lambda n: (0, 0)),
            pl.BlockSpec((1, C2), lambda n: (0, 0)),
        ],
        out_specs=pl.BlockSpec((Ho * Wo, C2), lambda n: (n, 0)),
        compiler_params=pltpu.CompilerParams(
            dimension_semantics=("parallel",),
            vmem_limit_bytes=VMEM_LIMIT),
    )(hs, w_mat,
      scale.reshape(1, C2).astype(jnp.float32),
      bias.reshape(1, C2).astype(jnp.float32))
    return out, Ho, Wo


# ------------------------------- JAX glue -----------------------------------

def w_to_mat(w_oihw):
    """PyTorch (Cout,Cin,kh,kw) -> ((kh*kw*Cin), Cout), tap-major (i, j, c)."""
    cout, cin, kh, kw = w_oihw.shape
    return jnp.transpose(w_oihw, (2, 3, 1, 0)).reshape(kh * kw * cin, cout)


def fold_bn(conv_bias, gamma, beta, mean, var):
    """Fold conv bias + eval-mode BN into per-channel (scale, bias), f32."""
    scale = gamma / jnp.sqrt(var + EPS)
    bias = (conv_bias - mean) * scale + beta
    return scale, bias


def identity_conv_block_forward(x_nchw, p, stride, bm=512):
    N, Cin, H, W = x_nchw.shape
    # NHWC, bf16 operands for the MXU; accumulation stays f32 in-kernel.
    x = jnp.transpose(x_nchw, (0, 2, 3, 1)).astype(jnp.bfloat16)

    w1 = w_to_mat(p["conv1_w"]).astype(jnp.bfloat16)
    w2 = w_to_mat(p["conv2_w"]).astype(jnp.bfloat16)
    w3 = w_to_mat(p["conv3_w"]).astype(jnp.bfloat16)
    wid = w_to_mat(p["id_w"]).astype(jnp.bfloat16)

    s1, b1 = fold_bn(p["conv1_b"], *p["bn1"])
    s2, b2 = fold_bn(p["conv2_b"], *p["bn2"])
    s3, b3 = fold_bn(p["conv3_b"], *p["bn3"])
    sid, bid = fold_bn(p["id_b"], *p["bn_id"])

    # conv1: 1x1 stride 1 + BN + ReLU (bf16 activations between stages)
    C1 = w1.shape[1]
    h = matmul_bn_relu(x.reshape(-1, Cin), w1, s1, b1,
                       relu=True, out_dtype=jnp.bfloat16, bm=bm)
    h = h.reshape(N, H, W, C1)

    # conv2: 3x3 stride=stride pad=1 + BN + ReLU (9 in-kernel accumulating dots)
    h, Ho, Wo = conv3x3_bn_relu(h, w2, s2, b2, stride, out_dtype=jnp.bfloat16)

    # identity-path input: stride-subsampled x.
    # TODO(synk): fold this subsample into the fused kernel's index_map to
    #             avoid even this small strided HBM copy.
    xi = x[:, ::stride, ::stride, :].reshape(-1, Cin)

    # conv3 + BN + identityConv + BN + add + ReLU, all in one fused kernel.
    out = fused_conv3_identity(h, w3, s3, b3, xi, wid, sid, bid,
                               out_dtype=jnp.float32, bm=bm)
    out = out.reshape(N, Ho, Wo, -1)
    return jnp.transpose(out, (0, 3, 1, 2))  # back to NCHW


# --------------------------- pure-JAX reference ------------------------------
# Reference uses the same bf16-operand / f32-accumulate recipe so the
# comparison isolates kernel correctness from the precision choice.

def _conv2d_ref(x_nhwc, w_oihw, b, stride, pad):
    w_hwio = jnp.transpose(w_oihw, (2, 3, 1, 0)).astype(jnp.bfloat16)
    y = jax.lax.conv_general_dilated(
        x_nhwc.astype(jnp.bfloat16), w_hwio, window_strides=(stride, stride),
        padding=((pad, pad), (pad, pad)),
        dimension_numbers=("NHWC", "HWIO", "NHWC"),
        preferred_element_type=jnp.float32)
    return y + b.reshape(1, 1, 1, -1)


def _bn_ref(x, gamma, beta, mean, var):
    return (x - mean) / jnp.sqrt(var + EPS) * gamma + beta


def reference_forward(x_nchw, p, stride):
    x = jnp.transpose(x_nchw, (0, 2, 3, 1)).astype(jnp.bfloat16)
    h = jnp.maximum(_bn_ref(_conv2d_ref(x, p["conv1_w"], p["conv1_b"], 1, 0),
                            *p["bn1"]), 0.0).astype(jnp.bfloat16)
    h = jnp.maximum(_bn_ref(_conv2d_ref(h, p["conv2_w"], p["conv2_b"], stride, 1),
                            *p["bn2"]), 0.0).astype(jnp.bfloat16)
    h = _bn_ref(_conv2d_ref(h, p["conv3_w"], p["conv3_b"], 1, 0), *p["bn3"])
    idn = _bn_ref(_conv2d_ref(x, p["id_w"], p["id_b"], stride, 0), *p["bn_id"])
    out = jnp.maximum(h + idn, 0.0)
    return jnp.transpose(out, (0, 3, 1, 2))


# ------------------------------ param init ----------------------------------

def _conv_init(key, cin, cout, k):
    k1, k2 = jax.random.split(key)
    fan = cin * k * k
    w = jax.random.normal(k1, (cout, cin, k, k), jnp.float32) / np.sqrt(fan)
    b = 0.1 * jax.random.normal(k2, (cout,), jnp.float32)
    return w, b


def _bn_init(key, c):
    k1, k2, k3, k4 = jax.random.split(key, 4)
    gamma = 1.0 + 0.1 * jax.random.normal(k1, (c,), jnp.float32)
    beta = 0.1 * jax.random.normal(k2, (c,), jnp.float32)
    mean = 0.1 * jax.random.normal(k3, (c,), jnp.float32)
    var = jnp.abs(jax.random.normal(k4, (c,), jnp.float32)) + 0.5
    return gamma, beta, mean, var


def make_params(key, in_filters, out_filters):
    expansion = 4
    keys = jax.random.split(key, 8)
    p = {}
    p["conv1_w"], p["conv1_b"] = _conv_init(keys[0], in_filters, out_filters, 1)
    p["bn1"] = _bn_init(keys[1], out_filters)
    p["conv2_w"], p["conv2_b"] = _conv_init(keys[2], out_filters, out_filters, 3)
    p["bn2"] = _bn_init(keys[3], out_filters)
    p["conv3_w"], p["conv3_b"] = _conv_init(keys[4], out_filters,
                                            out_filters * expansion, 1)
    p["bn3"] = _bn_init(keys[5], out_filters * expansion)
    p["id_w"], p["id_b"] = _conv_init(keys[6], in_filters,
                                      out_filters * expansion, 1)
    p["bn_id"] = _bn_init(keys[7], out_filters * expansion)
    return p


# --------------------------------- main --------------------------------------

if __name__ == "__main__":
    key = jax.random.PRNGKey(0)
    k_x, k_p = jax.random.split(key)

    batch, in_filters, out_filters, hw, stride = 2, 4, 4, 16, 2
    x = jax.random.normal(k_x, (batch, in_filters, hw, hw), jnp.float32)  # NCHW
    params = make_params(k_p, in_filters, out_filters)

    out = identity_conv_block_forward(x, params, stride)
    out = jax.block_until_ready(out)

    expected_shape = (batch, out_filters * 4, hw // stride, hw // stride)
    assert out.shape == expected_shape, (out.shape, expected_shape)

    ref = jax.block_until_ready(reference_forward(x, params, stride))
    if not np.allclose(np.asarray(out), np.asarray(ref), rtol=1e-2, atol=1e-2):
        raise AssertionError("Pallas output does not match JAX reference")

    print("KERNEL_OK")
</pallas_src>

<mosaic_0001>
module attributes {stable_mosaic.version = 11 : i64} {
  func.func @_matmul_bn_kernel(%arg0: i32, %arg1: memref<512x4xbf16, #tpu.memory_space<vmem>>, %arg2: memref<4x4xbf16, #tpu.memory_space<vmem>>, %arg3: memref<1x4xf32, #tpu.memory_space<vmem>>, %arg4: memref<1x4xf32, #tpu.memory_space<vmem>>, %arg5: memref<512x4xbf16, #tpu.memory_space<vmem>>) attributes {dimension_semantics = [#tpu.dimension_semantics<parallel>], iteration_bounds = array<i64: 1>, scalar_prefetch = 0 : i64, scratch_operands = 0 : i64, tpu.core_type = #tpu.core_type<tc>, window_params = [{transform_indices = @transform_0, window_bounds = array<i64: 512, 4>}, {pipeline_mode = #tpu.pipeline_mode<synchronous>, transform_indices = @transform_1, window_bounds = array<i64: 4, 4>}, {pipeline_mode = #tpu.pipeline_mode<synchronous>, transform_indices = @transform_2, window_bounds = array<i64: 1, 4>}, {pipeline_mode = #tpu.pipeline_mode<synchronous>, transform_indices = @transform_3, window_bounds = array<i64: 1, 4>}, {transform_indices = @transform_4, window_bounds = array<i64: 512, 4>}]} {
    %c0 = arith.constant 0 : index
    %c0_0 = arith.constant 0 : index
    %0 = vector.load %arg1[%c0, %c0_0] : memref<512x4xbf16, #tpu.memory_space<vmem>>, vector<512x4xbf16>
    %c0_1 = arith.constant 0 : index
    %c0_2 = arith.constant 0 : index
    %1 = vector.load %arg2[%c0_1, %c0_2] : memref<4x4xbf16, #tpu.memory_space<vmem>>, vector<4x4xbf16>
    %cst = arith.constant dense<0.000000e+00> : vector<512x4xf32>
    %2 = tpu.matmul %0, %1, %cst {dimension_numbers = #tpu.dot_dimension_numbers<[1], [0], [0], [1], [0, 0, 1, 1], [], []>} : vector<512x4xbf16>, vector<4x4xbf16>, vector<512x4xf32> -> vector<512x4xf32>
    %c0_3 = arith.constant 0 : index
    %c0_4 = arith.constant 0 : index
    %3 = vector.load %arg3[%c0_3, %c0_4] : memref<1x4xf32, #tpu.memory_space<vmem>>, vector<1x4xf32>
    %4 = vector.broadcast %3 : vector<1x4xf32> to vector<512x4xf32>
    %5 = arith.mulf %2, %4 : vector<512x4xf32>
    %c0_5 = arith.constant 0 : index
    %c0_6 = arith.constant 0 : index
    %6 = vector.load %arg4[%c0_5, %c0_6] : memref<1x4xf32, #tpu.memory_space<vmem>>, vector<1x4xf32>
    %7 = vector.broadcast %6 : vector<1x4xf32> to vector<512x4xf32>
    %8 = arith.addf %5, %7 : vector<512x4xf32>
    %cst_7 = arith.constant 0.000000e+00 : f32
    %9 = vector.broadcast %cst_7 : f32 to vector<512x4xf32>
    %10 = arith.maximumf %8, %9 : vector<512x4xf32>
    %11 = arith.truncf %10 : vector<512x4xf32> to vector<512x4xbf16>
    %c0_8 = arith.constant 0 : index
    %c0_9 = arith.constant 0 : index
    %12 = vector.load %arg5[%c0_8, %c0_9] : memref<512x4xbf16, #tpu.memory_space<vmem>>, vector<512x4xbf16>
    tpu.vector_store %arg5[%c0_8, %c0_9], %11 {strides = array<i32>} : memref<512x4xbf16, #tpu.memory_space<vmem>>, vector<512x4xbf16>,
    return
  }
  func.func @transform_0(%arg0: i32) -> (i32, i32) {
    %c0_i32 = arith.constant 0 : i32
    %c0_i32_0 = arith.constant 0 : i32
    return %arg0, %c0_i32 : i32, i32
  }
  func.func @transform_1(%arg0: i32) -> (i32, i32) {
    %c0_i32 = arith.constant 0 : i32
    %c0_i32_0 = arith.constant 0 : i32
    %c0_i32_1 = arith.constant 0 : i32
    return %c0_i32, %c0_i32_0 : i32, i32
  }
  func.func @transform_2(%arg0: i32) -> (i32, i32) {
    %c0_i32 = arith.constant 0 : i32
    %c0_i32_0 = arith.constant 0 : i32
    %c0_i32_1 = arith.constant 0 : i32
    return %c0_i32, %c0_i32_0 : i32, i32
  }
  func.func @transform_3(%arg0: i32) -> (i32, i32) {
    %c0_i32 = arith.constant 0 : i32
    %c0_i32_0 = arith.constant 0 : i32
    %c0_i32_1 = arith.constant 0 : i32
    return %c0_i32, %c0_i32_0 : i32, i32
  }
  func.func @transform_4(%arg0: i32) -> (i32, i32) {
    %c0_i32 = arith.constant 0 : i32
    %c0_i32_0 = arith.constant 0 : i32
    return %arg0, %c0_i32 : i32, i32
  }
}

</mosaic_0001>

<bundles_post_ra>
// kernel: tpu_custom_call.1
= control target key start
LH: loop header
LB: loop body
LE: loop exit
PB: predicated region body
PF: predicated region fallthrough
CT: control target
= control target key end

     0   :  { %vm340_vm0 = vcmask 1041408   ;;  %vm243_vm1 = vcmask 31744   ;;  %vm1095_vm2 = vcmask 27648   ;;  %s2043_s1 = inlined_call_operand.vmem [shape: bf16[4,4], index: 1, kind: input, shape index: {}]   ;;  %s2044_s0 = inlined_call_operand.vmem [shape: bf16[512,4], index: 0, kind: input, shape index: {}]   ;;  %s2045_s2 = inlined_call_operand.vmem [shape: f32[1,4], index: 2, kind: input, shape index: {}]   ;;  %s2046_s3 = inlined_call_operand.vmem [shape: f32[1,4], index: 3, kind: input, shape index: {}]   ;;  %s2047_s4 = inlined_call_operand.vmem [shape: bf16[512,4], index: 4, kind: output, shape index: {}]  }
   0x1   :  { %v82_v0 = vld [vmem:[%s2043_s1] sm:$0x3]  ;;  %v1463_v4 = vld [vmem:[%s2044_s0 + $0x8] sm:$0xff]   ;;  %v1465_v6 = vld [vmem:[%s2044_s0 + $0x10] sm:$0xff]  }
   0x2   :  { %1459 = vmatprep.subr.msk.bf16.mxu0 %vm340_vm0, %v82_v0  ;;  %1460 = vmatprep.subr.msk.bf16.mxu1 %vm340_vm0, %v82_v0  ;;  %v342_v1 = vsel %vm340_vm0, %v82_v0, 0  ;;  %v1461_v2 = vld [vmem:[%s2044_s0] sm:$0xff]   ;;  %v1464_v5 = vld [vmem:[%s2044_s0 + $0x88] sm:$0xff]   ;;  %v1466_v7 = vld [vmem:[%s2044_s0 + $0x90] sm:$0xff]  }
   0x3   :  { %1392 = vmatpush3.bf16.msra.mxu0 %v342_v1  ;;  %1458 = vmatpush3.bf16.msra.mxu1 %v342_v1  ;;  %v1462_v3 = vld [vmem:[%s2044_s0 + $0x80] sm:$0xff]   ;;  %v1467_v8 = vld [vmem:[%s2044_s0 + $0x18] sm:$0xff]   ;;  %v1471_v12 = vld [vmem:[%s2044_s0 + $0x28] sm:$0xff]  }
   0x4   :  { %1393 = vmatprep.mubr.msk.bf16.mxu0 %vm243_vm1, %v1461_v2  ;;  %1425 = vmatprep.mubr.msk.bf16.mxu1 %vm243_vm1, %v1462_v3  ;;  %v1468_v9 = vld [vmem:[%s2044_s0 + $0x98] sm:$0xff]   ;;  %v1469_v10 = vld [vmem:[%s2044_s0 + $0x20] sm:$0xff]   ;;  %v1472_v13 = vld [vmem:[%s2044_s0 + $0xa8] sm:$0xff]  }
   0x5   :  { %v1470_v11 = vld [vmem:[%s2044_s0 + $0xa0] sm:$0xff]   ;;  %v1473_v14 = vld [vmem:[%s2044_s0 + $0x30] sm:$0xff]   ;;  %v1475_v16 = vld [vmem:[%s2044_s0 + $0x38] sm:$0xff]  }
   0x6   :  { %1394 = vmatmul.mubr.msk.bf16.vlgmr.msra.gmra.mxu0 %vm243_vm1, %v1463_v4  ;;  %1426 = vmatmul.mubr.msk.bf16.vlgmr.msra.gmra.mxu1 %vm243_vm1, %v1464_v5  ;;  %v1474_v15 = vld [vmem:[%s2044_s0 + $0xb0] sm:$0xff]   ;;  %v1476_v17 = vld [vmem:[%s2044_s0 + $0xb8] sm:$0xff]   ;;  %v1477_v18 = vld [vmem:[%s2044_s0 + $0x40] sm:$0xff]  }
   0x7   :  { %1397 = vmatprep.mubr.msk.bf16.mxu0 %vm243_vm1, %v1465_v6  ;;  %1429 = vmatprep.mubr.msk.bf16.mxu1 %vm243_vm1, %v1466_v7  ;;  %v1478_v19 = vld [vmem:[%s2044_s0 + $0xc0] sm:$0xff]   ;;  %v1479_v20 = vld [vmem:[%s2044_s0 + $0x48] sm:$0xff]   ;;  %v1481_v22 = vld [vmem:[%s2044_s0 + $0x50] sm:$0xff]  }
   0x8   :  { %v1480_v21 = vld [vmem:[%s2044_s0 + $0xc8] sm:$0xff]   ;;  %v1482_v23 = vld [vmem:[%s2044_s0 + $0xd0] sm:$0xff]   ;;  %v1483_v24 = vld [vmem:[%s2044_s0 + $0x58] sm:$0xff]  }
   0x9   :  { %v1484_v25 = vld [vmem:[%s2044_s0 + $0xd8] sm:$0xff]   ;;  %v1485_v26 = vld [vmem:[%s2044_s0 + $0x60] sm:$0xff]   ;;  %v1487_v28 = vld [vmem:[%s2044_s0 + $0x68] sm:$0xff]  }
   0xa   :  { %v1486_v27 = vld [vmem:[%s2044_s0 + $0xe0] sm:$0xff]   ;;  %v1488_v29 = vld [vmem:[%s2044_s0 + $0xe8] sm:$0xff]   ;;  %v1489_v30 = vld [vmem:[%s2044_s0 + $0x70] sm:$0xff]  }
   0xb   :  { %v1490_v31 = vld [vmem:[%s2044_s0 + $0xf0] sm:$0xff]   ;;  %v1491_v32 = vld [vmem:[%s2044_s0 + $0x78] sm:$0xff]   ;;  %v1652_v34 = vld [vmem:[%s2045_s2] ss:$0 sm:$0xff] }
   0xc   :  { %v1492_v33 = vld [vmem:[%s2044_s0 + $0xf8] sm:$0xff]   ;;  %v1657_v36 = vld [vmem:[%s2046_s3] ss:$0 sm:$0xff] }
   0xe   :  { %1398 = vmatmul.mubr.msk.bf16.gmra.mxu0 %vm243_vm1, %v1467_v8  ;;  %1430 = vmatmul.mubr.msk.bf16.gmra.mxu1 %vm243_vm1, %v1468_v9 }
   0xf   :  { %1401 = vmatprep.mubr.msk.bf16.mxu0 %vm243_vm1, %v1469_v10  ;;  %1433 = vmatprep.mubr.msk.bf16.mxu1 %vm243_vm1, %v1470_v11 }
  0x16   :  { %1402 = vmatmul.mubr.msk.bf16.gmra.mxu0 %vm243_vm1, %v1471_v12  ;;  %1434 = vmatmul.mubr.msk.bf16.gmra.mxu1 %vm243_vm1, %v1472_v13 }
  0x17   :  { %1405 = vmatprep.mubr.msk.bf16.mxu0 %vm243_vm1, %v1473_v14  ;;  %1437 = vmatprep.mubr.msk.bf16.mxu1 %vm243_vm1, %v1474_v15 }
  0x1e   :  { %1406 = vmatmul.mubr.msk.bf16.gmra.mxu0 %vm243_vm1, %v1475_v16  ;;  %1438 = vmatmul.mubr.msk.bf16.gmra.mxu1 %vm243_vm1, %v1476_v17 }
  0x1f   :  { %1409 = vmatprep.mubr.msk.bf16.mxu0 %vm243_vm1, %v1477_v18  ;;  %1441 = vmatprep.mubr.msk.bf16.mxu1 %vm243_vm1, %v1478_v19 }
  0x26   :  { %1410 = vmatmul.mubr.msk.bf16.gmra.mxu0 %vm243_vm1, %v1479_v20  ;;  %1442 = vmatmul.mubr.msk.bf16.gmra.mxu1 %vm243_vm1, %v1480_v21 }
  0x27   :  { %1413 = vmatprep.mubr.msk.bf16.mxu0 %vm243_vm1, %v1481_v22  ;;  %1445 = vmatprep.mubr.msk.bf16.mxu1 %vm243_vm1, %v1482_v23 }
  0x2e   :  { %1414 = vmatmul.mubr.msk.bf16.gmra.mxu0 %vm243_vm1, %v1483_v24  ;;  %1446 = vmatmul.mubr.msk.bf16.gmra.mxu1 %vm243_vm1, %v1484_v25 }
  0x2f   :  { %1417 = vmatprep.mubr.msk.bf16.mxu0 %vm243_vm1, %v1485_v26  ;;  %1449 = vmatprep.mubr.msk.bf16.mxu1 %vm243_vm1, %v1486_v27 }
  0x36   :  { %1418 = vmatmul.mubr.msk.bf16.gmra.mxu0 %vm243_vm1, %v1487_v28  ;;  %1450 = vmatmul.mubr.msk.bf16.gmra.mxu1 %vm243_vm1, %v1488_v29 }
  0x37   :  { %1421 = vmatprep.mubr.msk.bf16.mxu0 %vm243_vm1, %v1489_v30  ;;  %1453 = vmatprep.mubr.msk.bf16.mxu1 %vm243_vm1, %v1490_v31 }
  0x3e   :  { %1422 = vmatmul.mubr.msk.bf16.gmra.mxu0 %vm243_vm1, %v1491_v32  ;;  %1454 = vmatmul.mubr.msk.bf16.gmra.mxu1 %vm243_vm1, %v1492_v33 }
  0xc6   :  { %v1395_v35 = vpop.f32.mrf.mxu0  ;;  %v1427_v38 = vpop.f32.mrf.mxu1 }
  0xc7   :  { %v642_v37 = vmul.f32 %v1395_v35, %v1652_v34  ;;  %v674_v39 = vmul.f32 %v1427_v38, %v1652_v34 }
  0xc8   :  { %v378_v40 = vpop.f32.mrf.mxu0  ;;  %v506_v43 = vpop.f32.mrf.mxu1 }
  0xc9   :  { %v713_v41 = vadd.f32 %v1657_v36, %v642_v37  ;;  %v640_v42 = vmul.f32 %v1652_v34, %v378_v40  ;;  %v745_v44 = vadd.f32 %v1657_v36, %v674_v39  ;;  %v672_v45 = vmul.f32 %v1652_v34, %v506_v43 }
  0xca   :  { %v1396_v46 = vpop.f32.mrf.mxu0  ;;  %v1428_v50 = vpop.f32.mrf.mxu1 }
  0xcb   :  { %v777_v47 = vmax.f32 %v713_v41, 0.0  ;;  %v711_v48 = vadd.f32 %v1657_v36, %v640_v42  ;;  %v643_v49 = vmul.f32 %v1396_v46, %v1652_v34  ;;  %v809_v51 = vmax.f32 %v745_v44, 0.0 }
  0xcc   :  { %v743_v52 = vadd.f32 %v1657_v36, %v672_v45  ;;  %v675_v53 = vmul.f32 %v1428_v50, %v1652_v34  ;;  %v381_v54 = vpop.f32.mrf.mxu0  ;;  %v509_v59 = vpop.f32.mrf.mxu1 }
  0xcd   :  { %v1296_v55 = vpack.c.bf16 %v777_v47, %v777_v47  ;;  %v775_v56 = vmax.f32 %v711_v48, 0.0  ;;  %v714_v57 = vadd.f32 %v1657_v36, %v643_v49  ;;  %v641_v58 = vmul.f32 %v1652_v34, %v381_v54 }
  0xce   :  { %v1328_v60 = vpack.c.bf16 %v809_v51, %v809_v51  ;;  %v807_v61 = vmax.f32 %v743_v52, 0.0  ;;  %v746_v62 = vadd.f32 %v1657_v36, %v675_v53  ;;  %v673_v63 = vmul.f32 %v1652_v34, %v509_v59  ;;  %v1399_v0 = vpop.f32.mrf.mxu0  ;;  %v1431_v5 = vpop.f32.mrf.mxu1 }
  0xcf   :  { %1098 = vst.msk [vmem:[%s2047_s4 + $0x8] sm:$0xf] %vm1095_vm2, %v1296_v55  ;;  %v1294_v1 = vpack.c.bf16 %v775_v56, %v775_v56  ;;  %v778_v2 = vmax.f32 %v714_v57, 0.0  ;;  %v712_v3 = vadd.f32 %v1657_v36, %v641_v58  ;;  %v646_v4 = vmul.f32 %v1399_v0, %v1652_v34 }
  0xd0   :  { %1130 = vst.msk [vmem:[%s2047_s4 + $0x88] sm:$0xf] %vm1095_vm2, %v1328_v60  ;;  %v1326_v6 = vpack.c.bf16 %v807_v61, %v807_v61  ;;  %v810_v7 = vmax.f32 %v746_v62, 0.0  ;;  %v744_v8 = vadd.f32 %v1657_v36, %v673_v63  ;;  %v678_v9 = vmul.f32 %v1431_v5, %v1652_v34  ;;  %v394_v10 = vpop.f32.mrf.mxu0  ;;  %v522_v15 = vpop.f32.mrf.mxu1 }
  0xd1   :  { %1096 = vst.msk [vmem:[%s2047_s4] sm:$0xf] %vm1095_vm2, %v1294_v1  ;;  %v1297_v11 = vpack.c.bf16 %v778_v2, %v778_v2  ;;  %v776_v12 = vmax.f32 %v712_v3, 0.0  ;;  %v717_v13 = vadd.f32 %v1657_v36, %v646_v4  ;;  %v644_v14 = vmul.f32 %v1652_v34, %v394_v10 }
  0xd2   :  { %1128 = vst.msk [vmem:[%s2047_s4 + $0x80] sm:$0xf] %vm1095_vm2, %v1326_v6  ;;  %v1329_v16 = vpack.c.bf16 %v810_v7, %v810_v7  ;;  %v808_v17 = vmax.f32 %v744_v8, 0.0  ;;  %v749_v18 = vadd.f32 %v1657_v36, %v678_v9  ;;  %v676_v19 = vmul.f32 %v1652_v34, %v522_v15  ;;  %v1400_v20 = vpop.f32.mrf.mxu0  ;;  %v1432_v25 = vpop.f32.mrf.mxu1 }
  0xd3   :  { %1099 = vst.msk [vmem:[%s2047_s4 + $0xc] sm:$0xf] %vm1095_vm2, %v1297_v11  ;;  %v1295_v21 = vpack.c.bf16 %v776_v12, %v776_v12  ;;  %v781_v22 = vmax.f32 %v717_v13, 0.0  ;;  %v715_v23 = vadd.f32 %v1657_v36, %v644_v14  ;;  %v647_v24 = vmul.f32 %v1400_v20, %v1652_v34 }
  0xd4   :  { %1131 = vst.msk [vmem:[%s2047_s4 + $0x8c] sm:$0xf] %vm1095_vm2, %v1329_v16  ;;  %v1327_v26 = vpack.c.bf16 %v808_v17, %v808_v17  ;;  %v813_v27 = vmax.f32 %v749_v18, 0.0  ;;  %v747_v28 = vadd.f32 %v1657_v36, %v676_v19  ;;  %v679_v29 = vmul.f32 %v1432_v25, %v1652_v34  ;;  %v397_v30 = vpop.f32.mrf.mxu0  ;;  %v525_v37 = vpop.f32.mrf.mxu1 }
  0xd5   :  { %1097 = vst.msk [vmem:[%s2047_s4 + $0x4] sm:$0xf] %vm1095_vm2, %v1295_v21  ;;  %v1300_v31 = vpack.c.bf16 %v781_v22, %v781_v22  ;;  %v779_v32 = vmax.f32 %v715_v23, 0.0  ;;  %v718_v33 = vadd.f32 %v1657_v36, %v647_v24  ;;  %v645_v35 = vmul.f32 %v1652_v34, %v397_v30 }
  0xd6   :  { %1129 = vst.msk [vmem:[%s2047_s4 + $0x84] sm:$0xf] %vm1095_vm2, %v1327_v26  ;;  %v1332_v38 = vpack.c.bf16 %v813_v27, %v813_v27  ;;  %v811_v39 = vmax.f32 %v747_v28, 0.0  ;;  %v750_v40 = vadd.f32 %v1657_v36, %v679_v29  ;;  %v677_v41 = vmul.f32 %v1652_v34, %v525_v37  ;;  %v1403_v42 = vpop.f32.mrf.mxu0  ;;  %v1435_v47 = vpop.f32.mrf.mxu1 }
  0xd7   :  { %1102 = vst.msk [vmem:[%s2047_s4 + $0x18] sm:$0xf] %vm1095_vm2, %v1300_v31  ;;  %v1298_v43 = vpack.c.bf16 %v779_v32, %v779_v32  ;;  %v782_v44 = vmax.f32 %v718_v33, 0.0  ;;  %v716_v45 = vadd.f32 %v1657_v36, %v645_v35  ;;  %v650_v46 = vmul.f32 %v1403_v42, %v1652_v34 }
  0xd8   :  { %1134 = vst.msk [vmem:[%s2047_s4 + $0x98] sm:$0xf] %vm1095_vm2, %v1332_v38  ;;  %v1330_v48 = vpack.c.bf16 %v811_v39, %v811_v39  ;;  %v814_v49 = vmax.f32 %v750_v40, 0.0  ;;  %v748_v50 = vadd.f32 %v1657_v36, %v677_v41  ;;  %v682_v51 = vmul.f32 %v1435_v47, %v1652_v34  ;;  %v410_v52 = vpop.f32.mrf.mxu0  ;;  %v538_v57 = vpop.f32.mrf.mxu1 }
  0xd9   :  { %1100 = vst.msk [vmem:[%s2047_s4 + $0x10] sm:$0xf] %vm1095_vm2, %v1298_v43  ;;  %v1301_v53 = vpack.c.bf16 %v782_v44, %v782_v44  ;;  %v780_v54 = vmax.f32 %v716_v45, 0.0  ;;  %v721_v55 = vadd.f32 %v1657_v36, %v650_v46  ;;  %v648_v56 = vmul.f32 %v1652_v34, %v410_v52 }
  0xda   :  { %1132 = vst.msk [vmem:[%s2047_s4 + $0x90] sm:$0xf] %vm1095_vm2, %v1330_v48  ;;  %v1333_v58 = vpack.c.bf16 %v814_v49, %v814_v49  ;;  %v812_v59 = vmax.f32 %v748_v50, 0.0  ;;  %v753_v60 = vadd.f32 %v1657_v36, %v682_v51  ;;  %v680_v61 = vmul.f32 %v1652_v34, %v538_v57  ;;  %v1404_v62 = vpop.f32.mrf.mxu0  ;;  %v1436_v3 = vpop.f32.mrf.mxu1 }
  0xdb   :  { %1103 = vst.msk [vmem:[%s2047_s4 + $0x1c] sm:$0xf] %vm1095_vm2, %v1301_v53  ;;  %v1299_v63 = vpack.c.bf16 %v780_v54, %v780_v54  ;;  %v785_v0 = vmax.f32 %v721_v55, 0.0  ;;  %v719_v1 = vadd.f32 %v1657_v36, %v648_v56  ;;  %v651_v2 = vmul.f32 %v1404_v62, %v1652_v34 }
  0xdc   :  { %1135 = vst.msk [vmem:[%s2047_s4 + $0x9c] sm:$0xf] %vm1095_vm2, %v1333_v58  ;;  %v1331_v4 = vpack.c.bf16 %v812_v59, %v812_v59  ;;  %v817_v5 = vmax.f32 %v753_v60, 0.0  ;;  %v751_v6 = vadd.f32 %v1657_v36, %v680_v61  ;;  %v683_v7 = vmul.f32 %v1436_v3, %v1652_v34  ;;  %v413_v8 = vpop.f32.mrf.mxu0  ;;  %v541_v13 = vpop.f32.mrf.mxu1 }
  0xdd   :  { %1101 = vst.msk [vmem:[%s2047_s4 + $0x14] sm:$0xf] %vm1095_vm2, %v1299_v63  ;;  %v1304_v9 = vpack.c.bf16 %v785_v0, %v785_v0  ;;  %v783_v10 = vmax.f32 %v719_v1, 0.0  ;;  %v722_v11 = vadd.f32 %v1657_v36, %v651_v2  ;;  %v649_v12 = vmul.f32 %v1652_v34, %v413_v8 }
  0xde   :  { %1133 = vst.msk [vmem:[%s2047_s4 + $0x94] sm:$0xf] %vm1095_vm2, %v1331_v4  ;;  %v1336_v14 = vpack.c.bf16 %v817_v5, %v817_v5  ;;  %v815_v15 = vmax.f32 %v751_v6, 0.0  ;;  %v754_v16 = vadd.f32 %v1657_v36, %v683_v7  ;;  %v681_v17 = vmul.f32 %v1652_v34, %v541_v13  ;;  %v1407_v18 = vpop.f32.mrf.mxu0  ;;  %v1439_v23 = vpop.f32.mrf.mxu1 }
  0xdf   :  { %1106 = vst.msk [vmem:[%s2047_s4 + $0x28] sm:$0xf] %vm1095_vm2, %v1304_v9  ;;  %v1302_v19 = vpack.c.bf16 %v783_v10, %v783_v10  ;;  %v786_v20 = vmax.f32 %v722_v11, 0.0  ;;  %v720_v21 = vadd.f32 %v1657_v36, %v649_v12  ;;  %v654_v22 = vmul.f32 %v1407_v18, %v1652_v34 }
  0xe0   :  { %1138 = vst.msk [vmem:[%s2047_s4 + $0xa8] sm:$0xf] %vm1095_vm2, %v1336_v14  ;;  %v1334_v24 = vpack.c.bf16 %v815_v15, %v815_v15  ;;  %v818_v25 = vmax.f32 %v754_v16, 0.0  ;;  %v752_v26 = vadd.f32 %v1657_v36, %v681_v17  ;;  %v686_v27 = vmul.f32 %v1439_v23, %v1652_v34  ;;  %v426_v28 = vpop.f32.mrf.mxu0  ;;  %v554_v33 = vpop.f32.mrf.mxu1 }
  0xe1   :  { %1104 = vst.msk [vmem:[%s2047_s4 + $0x20] sm:$0xf] %vm1095_vm2, %v1302_v19  ;;  %v1305_v29 = vpack.c.bf16 %v786_v20, %v786_v20  ;;  %v784_v30 = vmax.f32 %v720_v21, 0.0  ;;  %v725_v31 = vadd.f32 %v1657_v36, %v654_v22  ;;  %v652_v32 = vmul.f32 %v1652_v34, %v426_v28 }
  0xe2   :  { %1136 = vst.msk [vmem:[%s2047_s4 + $0xa0] sm:$0xf] %vm1095_vm2, %v1334_v24  ;;  %v1337_v35 = vpack.c.bf16 %v818_v25, %v818_v25  ;;  %v816_v37 = vmax.f32 %v752_v26, 0.0  ;;  %v757_v38 = vadd.f32 %v1657_v36, %v686_v27  ;;  %v684_v39 = vmul.f32 %v1652_v34, %v554_v33  ;;  %v1408_v40 = vpop.f32.mrf.mxu0  ;;  %v1440_v45 = vpop.f32.mrf.mxu1 }
  0xe3   :  { %1107 = vst.msk [vmem:[%s2047_s4 + $0x2c] sm:$0xf] %vm1095_vm2, %v1305_v29  ;;  %v1303_v41 = vpack.c.bf16 %v784_v30, %v784_v30  ;;  %v789_v42 = vmax.f32 %v725_v31, 0.0  ;;  %v723_v43 = vadd.f32 %v1657_v36, %v652_v32  ;;  %v655_v44 = vmul.f32 %v1408_v40, %v1652_v34 }
  0xe4   :  { %1139 = vst.msk [vmem:[%s2047_s4 + $0xac] sm:$0xf] %vm1095_vm2, %v1337_v35  ;;  %v1335_v46 = vpack.c.bf16 %v816_v37, %v816_v37  ;;  %v821_v47 = vmax.f32 %v757_v38, 0.0  ;;  %v755_v48 = vadd.f32 %v1657_v36, %v684_v39  ;;  %v687_v49 = vmul.f32 %v1440_v45, %v1652_v34  ;;  %v429_v50 = vpop.f32.mrf.mxu0  ;;  %v557_v55 = vpop.f32.mrf.mxu1 }
  0xe5   :  { %1105 = vst.msk [vmem:[%s2047_s4 + $0x24] sm:$0xf] %vm1095_vm2, %v1303_v41  ;;  %v1308_v51 = vpack.c.bf16 %v789_v42, %v789_v42  ;;  %v787_v52 = vmax.f32 %v723_v43, 0.0  ;;  %v726_v53 = vadd.f32 %v1657_v36, %v655_v44  ;;  %v653_v54 = vmul.f32 %v1652_v34, %v429_v50 }
  0xe6   :  { %1137 = vst.msk [vmem:[%s2047_s4 + $0xa4] sm:$0xf] %vm1095_vm2, %v1335_v46  ;;  %v1340_v56 = vpack.c.bf16 %v821_v47, %v821_v47  ;;  %v819_v57 = vmax.f32 %v755_v48, 0.0  ;;  %v758_v58 = vadd.f32 %v1657_v36, %v687_v49  ;;  %v685_v59 = vmul.f32 %v1652_v34, %v557_v55  ;;  %v1411_v60 = vpop.f32.mrf.mxu0  ;;  %v1443_v1 = vpop.f32.mrf.mxu1 }
  0xe7   :  { %1110 = vst.msk [vmem:[%s2047_s4 + $0x38] sm:$0xf] %vm1095_vm2, %v1308_v51  ;;  %v1306_v61 = vpack.c.bf16 %v787_v52, %v787_v52  ;;  %v790_v62 = vmax.f32 %v726_v53, 0.0  ;;  %v724_v63 = vadd.f32 %v1657_v36, %v653_v54  ;;  %v658_v0 = vmul.f32 %v1411_v60, %v1652_v34 }
  0xe8   :  { %1142 = vst.msk [vmem:[%s2047_s4 + $0xb8] sm:$0xf] %vm1095_vm2, %v1340_v56  ;;  %v1338_v2 = vpack.c.bf16 %v819_v57, %v819_v57  ;;  %v822_v3 = vmax.f32 %v758_v58, 0.0  ;;  %v756_v4 = vadd.f32 %v1657_v36, %v685_v59  ;;  %v690_v5 = vmul.f32 %v1443_v1, %v1652_v34  ;;  %v442_v6 = vpop.f32.mrf.mxu0  ;;  %v570_v11 = vpop.f32.mrf.mxu1 }
  0xe9   :  { %1108 = vst.msk [vmem:[%s2047_s4 + $0x30] sm:$0xf] %vm1095_vm2, %v1306_v61  ;;  %v1309_v7 = vpack.c.bf16 %v790_v62, %v790_v62  ;;  %v788_v8 = vmax.f32 %v724_v63, 0.0  ;;  %v729_v9 = vadd.f32 %v1657_v36, %v658_v0  ;;  %v656_v10 = vmul.f32 %v1652_v34, %v442_v6 }
  0xea   :  { %1140 = vst.msk [vmem:[%s2047_s4 + $0xb0] sm:$0xf] %vm1095_vm2, %v1338_v2  ;;  %v1341_v12 = vpack.c.bf16 %v822_v3, %v822_v3  ;;  %v820_v13 = vmax.f32 %v756_v4, 0.0  ;;  %v761_v14 = vadd.f32 %v1657_v36, %v690_v5  ;;  %v688_v15 = vmul.f32 %v1652_v34, %v570_v11  ;;  %v1412_v16 = vpop.f32.mrf.mxu0  ;;  %v1444_v21 = vpop.f32.mrf.mxu1 }
  0xeb   :  { %1111 = vst.msk [vmem:[%s2047_s4 + $0x3c] sm:$0xf] %vm1095_vm2, %v1309_v7  ;;  %v1307_v17 = vpack.c.bf16 %v788_v8, %v788_v8  ;;  %v793_v18 = vmax.f32 %v729_v9, 0.0  ;;  %v727_v19 = vadd.f32 %v1657_v36, %v656_v10  ;;  %v659_v20 = vmul.f32 %v1412_v16, %v1652_v34 }
  0xec   :  { %1143 = vst.msk [vmem:[%s2047_s4 + $0xbc] sm:$0xf] %vm1095_vm2, %v1341_v12  ;;  %v1339_v22 = vpack.c.bf16 %v820_v13, %v820_v13  ;;  %v825_v23 = vmax.f32 %v761_v14, 0.0  ;;  %v759_v24 = vadd.f32 %v1657_v36, %v688_v15  ;;  %v691_v25 = vmul.f32 %v1444_v21, %v1652_v34  ;;  %v445_v26 = vpop.f32.mrf.mxu0  ;;  %v573_v31 = vpop.f32.mrf.mxu1 }
  0xed   :  { %1109 = vst.msk [vmem:[%s2047_s4 + $0x34] sm:$0xf] %vm1095_vm2, %v1307_v17  ;;  %v1312_v27 = vpack.c.bf16 %v793_v18, %v793_v18  ;;  %v791_v28 = vmax.f32 %v727_v19, 0.0  ;;  %v730_v29 = vadd.f32 %v1657_v36, %v659_v20  ;;  %v657_v30 = vmul.f32 %v1652_v34, %v445_v26 }
  0xee   :  { %1141 = vst.msk [vmem:[%s2047_s4 + $0xb4] sm:$0xf] %vm1095_vm2, %v1339_v22  ;;  %v1344_v32 = vpack.c.bf16 %v825_v23, %v825_v23  ;;  %v823_v33 = vmax.f32 %v759_v24, 0.0  ;;  %v762_v35 = vadd.f32 %v1657_v36, %v691_v25  ;;  %v689_v37 = vmul.f32 %v1652_v34, %v573_v31  ;;  %v1415_v38 = vpop.f32.mrf.mxu0  ;;  %v1447_v43 = vpop.f32.mrf.mxu1 }
  0xef   :  { %1114 = vst.msk [vmem:[%s2047_s4 + $0x48] sm:$0xf] %vm1095_vm2, %v1312_v27  ;;  %v1310_v39 = vpack.c.bf16 %v791_v28, %v791_v28  ;;  %v794_v40 = vmax.f32 %v730_v29, 0.0  ;;  %v728_v41 = vadd.f32 %v1657_v36, %v657_v30  ;;  %v662_v42 = vmul.f32 %v1415_v38, %v1652_v34 }
  0xf0   :  { %1146 = vst.msk [vmem:[%s2047_s4 + $0xc8] sm:$0xf] %vm1095_vm2, %v1344_v32  ;;  %v1342_v44 = vpack.c.bf16 %v823_v33, %v823_v33  ;;  %v826_v45 = vmax.f32 %v762_v35, 0.0  ;;  %v760_v46 = vadd.f32 %v1657_v36, %v689_v37  ;;  %v694_v47 = vmul.f32 %v1447_v43, %v1652_v34  ;;  %v458_v48 = vpop.f32.mrf.mxu0  ;;  %v586_v53 = vpop.f32.mrf.mxu1 }
  0xf1   :  { %1112 = vst.msk [vmem:[%s2047_s4 + $0x40] sm:$0xf] %vm1095_vm2, %v1310_v39  ;;  %v1313_v49 = vpack.c.bf16 %v794_v40, %v794_v40  ;;  %v792_v50 = vmax.f32 %v728_v41, 0.0  ;;  %v733_v51 = vadd.f32 %v1657_v36, %v662_v42  ;;  %v660_v52 = vmul.f32 %v1652_v34, %v458_v48 }
  0xf2   :  { %1144 = vst.msk [vmem:[%s2047_s4 + $0xc0] sm:$0xf] %vm1095_vm2, %v1342_v44  ;;  %v1345_v54 = vpack.c.bf16 %v826_v45, %v826_v45  ;;  %v824_v55 = vmax.f32 %v760_v46, 0.0  ;;  %v765_v56 = vadd.f32 %v1657_v36, %v694_v47  ;;  %v692_v57 = vmul.f32 %v1652_v34, %v586_v53  ;;  %v1416_v58 = vpop.f32.mrf.mxu0  ;;  %v1448_v63 = vpop.f32.mrf.mxu1 }
  0xf3   :  { %1115 = vst.msk [vmem:[%s2047_s4 + $0x4c] sm:$0xf] %vm1095_vm2, %v1313_v49  ;;  %v1311_v59 = vpack.c.bf16 %v792_v50, %v792_v50  ;;  %v797_v60 = vmax.f32 %v733_v51, 0.0  ;;  %v731_v61 = vadd.f32 %v1657_v36, %v660_v52  ;;  %v663_v62 = vmul.f32 %v1416_v58, %v1652_v34 }
  0xf4   :  { %1147 = vst.msk [vmem:[%s2047_s4 + $0xcc] sm:$0xf] %vm1095_vm2, %v1345_v54  ;;  %v1343_v0 = vpack.c.bf16 %v824_v55, %v824_v55  ;;  %v829_v1 = vmax.f32 %v765_v56, 0.0  ;;  %v763_v2 = vadd.f32 %v1657_v36, %v692_v57  ;;  %v695_v3 = vmul.f32 %v1448_v63, %v1652_v34  ;;  %v461_v4 = vpop.f32.mrf.mxu0  ;;  %v589_v9 = vpop.f32.mrf.mxu1 }
  0xf5   :  { %1113 = vst.msk [vmem:[%s2047_s4 + $0x44] sm:$0xf] %vm1095_vm2, %v1311_v59  ;;  %v1316_v5 = vpack.c.bf16 %v797_v60, %v797_v60  ;;  %v795_v6 = vmax.f32 %v731_v61, 0.0  ;;  %v734_v7 = vadd.f32 %v1657_v36, %v663_v62  ;;  %v661_v8 = vmul.f32 %v1652_v34, %v461_v4 }
  0xf6   :  { %1145 = vst.msk [vmem:[%s2047_s4 + $0xc4] sm:$0xf] %vm1095_vm2, %v1343_v0  ;;  %v1348_v10 = vpack.c.bf16 %v829_v1, %v829_v1  ;;  %v827_v11 = vmax.f32 %v763_v2, 0.0  ;;  %v766_v12 = vadd.f32 %v1657_v36, %v695_v3  ;;  %v693_v13 = vmul.f32 %v1652_v34, %v589_v9  ;;  %v1419_v14 = vpop.f32.mrf.mxu0  ;;  %v1451_v19 = vpop.f32.mrf.mxu1 }
  0xf7   :  { %1118 = vst.msk [vmem:[%s2047_s4 + $0x58] sm:$0xf] %vm1095_vm2, %v1316_v5  ;;  %v1314_v15 = vpack.c.bf16 %v795_v6, %v795_v6  ;;  %v798_v16 = vmax.f32 %v734_v7, 0.0  ;;  %v732_v17 = vadd.f32 %v1657_v36, %v661_v8  ;;  %v666_v18 = vmul.f32 %v1419_v14, %v1652_v34 }
  0xf8   :  { %1150 = vst.msk [vmem:[%s2047_s4 + $0xd8] sm:$0xf] %vm1095_vm2, %v1348_v10  ;;  %v1346_v20 = vpack.c.bf16 %v827_v11, %v827_v11  ;;  %v830_v21 = vmax.f32 %v766_v12, 0.0  ;;  %v764_v22 = vadd.f32 %v1657_v36, %v693_v13  ;;  %v698_v23 = vmul.f32 %v1451_v19, %v1652_v34  ;;  %v474_v24 = vpop.f32.mrf.mxu0  ;;  %v602_v29 = vpop.f32.mrf.mxu1 }
  0xf9   :  { %1116 = vst.msk [vmem:[%s2047_s4 + $0x50] sm:$0xf] %vm1095_vm2, %v1314_v15  ;;  %v1317_v25 = vpack.c.bf16 %v798_v16, %v798_v16  ;;  %v796_v26 = vmax.f32 %v732_v17, 0.0  ;;  %v737_v27 = vadd.f32 %v1657_v36, %v666_v18  ;;  %v664_v28 = vmul.f32 %v1652_v34, %v474_v24 }
  0xfa   :  { %1148 = vst.msk [vmem:[%s2047_s4 + $0xd0] sm:$0xf] %vm1095_vm2, %v1346_v20  ;;  %v1349_v30 = vpack.c.bf16 %v830_v21, %v830_v21  ;;  %v828_v31 = vmax.f32 %v764_v22, 0.0  ;;  %v769_v32 = vadd.f32 %v1657_v36, %v698_v23  ;;  %v696_v33 = vmul.f32 %v1652_v34, %v602_v29  ;;  %v1420_v35 = vpop.f32.mrf.mxu0  ;;  %v1452_v41 = vpop.f32.mrf.mxu1 }
  0xfb   :  { %1119 = vst.msk [vmem:[%s2047_s4 + $0x5c] sm:$0xf] %vm1095_vm2, %v1317_v25  ;;  %v1315_v37 = vpack.c.bf16 %v796_v26, %v796_v26  ;;  %v801_v38 = vmax.f32 %v737_v27, 0.0  ;;  %v735_v39 = vadd.f32 %v1657_v36, %v664_v28  ;;  %v667_v40 = vmul.f32 %v1420_v35, %v1652_v34 }
  0xfc   :  { %1151 = vst.msk [vmem:[%s2047_s4 + $0xdc] sm:$0xf] %vm1095_vm2, %v1349_v30  ;;  %v1347_v42 = vpack.c.bf16 %v828_v31, %v828_v31  ;;  %v833_v43 = vmax.f32 %v769_v32, 0.0  ;;  %v767_v44 = vadd.f32 %v1657_v36, %v696_v33  ;;  %v699_v45 = vmul.f32 %v1452_v41, %v1652_v34  ;;  %v477_v46 = vpop.f32.mrf.mxu0  ;;  %v605_v51 = vpop.f32.mrf.mxu1 }
  0xfd   :  { %1117 = vst.msk [vmem:[%s2047_s4 + $0x54] sm:$0xf] %vm1095_vm2, %v1315_v37  ;;  %v1320_v47 = vpack.c.bf16 %v801_v38, %v801_v38  ;;  %v799_v48 = vmax.f32 %v735_v39, 0.0  ;;  %v738_v49 = vadd.f32 %v1657_v36, %v667_v40  ;;  %v665_v50 = vmul.f32 %v1652_v34, %v477_v46 }
  0xfe   :  { %1149 = vst.msk [vmem:[%s2047_s4 + $0xd4] sm:$0xf] %vm1095_vm2, %v1347_v42  ;;  %v1352_v52 = vpack.c.bf16 %v833_v43, %v833_v43  ;;  %v831_v53 = vmax.f32 %v767_v44, 0.0  ;;  %v770_v54 = vadd.f32 %v1657_v36, %v699_v45  ;;  %v697_v55 = vmul.f32 %v1652_v34, %v605_v51  ;;  %v1423_v56 = vpop.f32.mrf.mxu0  ;;  %v1455_v61 = vpop.f32.mrf.mxu1 }
  0xff   :  { %1122 = vst.msk [vmem:[%s2047_s4 + $0x68] sm:$0xf] %vm1095_vm2, %v1320_v47  ;;  %v1318_v57 = vpack.c.bf16 %v799_v48, %v799_v48  ;;  %v802_v58 = vmax.f32 %v738_v49, 0.0  ;;  %v736_v59 = vadd.f32 %v1657_v36, %v665_v50  ;;  %v670_v60 = vmul.f32 %v1423_v56, %v1652_v34 }
 0x100   :  { %1154 = vst.msk [vmem:[%s2047_s4 + $0xe8] sm:$0xf] %vm1095_vm2, %v1352_v52  ;;  %v1350_v62 = vpack.c.bf16 %v831_v53, %v831_v53  ;;  %v834_v63 = vmax.f32 %v770_v54, 0.0  ;;  %v768_v0 = vadd.f32 %v1657_v36, %v697_v55  ;;  %v702_v1 = vmul.f32 %v1455_v61, %v1652_v34  ;;  %v490_v2 = vpop.f32.mrf.mxu0  ;;  %v618_v7 = vpop.f32.mrf.mxu1 }
 0x101   :  { %1120 = vst.msk [vmem:[%s2047_s4 + $0x60] sm:$0xf] %vm1095_vm2, %v1318_v57  ;;  %v1321_v3 = vpack.c.bf16 %v802_v58, %v802_v58  ;;  %v800_v4 = vmax.f32 %v736_v59, 0.0  ;;  %v741_v5 = vadd.f32 %v1657_v36, %v670_v60  ;;  %v668_v6 = vmul.f32 %v1652_v34, %v490_v2 }
 0x102   :  { %1152 = vst.msk [vmem:[%s2047_s4 + $0xe0] sm:$0xf] %vm1095_vm2, %v1350_v62  ;;  %v1353_v8 = vpack.c.bf16 %v834_v63, %v834_v63  ;;  %v832_v9 = vmax.f32 %v768_v0, 0.0  ;;  %v773_v10 = vadd.f32 %v1657_v36, %v702_v1  ;;  %v700_v11 = vmul.f32 %v1652_v34, %v618_v7  ;;  %v1424_v12 = vpop.f32.mrf.mxu0  ;;  %v1456_v17 = vpop.f32.mrf.mxu1 }
 0x103   :  { %1123 = vst.msk [vmem:[%s2047_s4 + $0x6c] sm:$0xf] %vm1095_vm2, %v1321_v3  ;;  %v1319_v13 = vpack.c.bf16 %v800_v4, %v800_v4  ;;  %v805_v14 = vmax.f32 %v741_v5, 0.0  ;;  %v739_v15 = vadd.f32 %v1657_v36, %v668_v6  ;;  %v671_v16 = vmul.f32 %v1424_v12, %v1652_v34 }
 0x104   :  { %1155 = vst.msk [vmem:[%s2047_s4 + $0xec] sm:$0xf] %vm1095_vm2, %v1353_v8  ;;  %v1351_v18 = vpack.c.bf16 %v832_v9, %v832_v9  ;;  %v837_v19 = vmax.f32 %v773_v10, 0.0  ;;  %v771_v20 = vadd.f32 %v1657_v36, %v700_v11  ;;  %v703_v21 = vmul.f32 %v1456_v17, %v1652_v34  ;;  %v493_v22 = vpop.f32.mrf.mxu0  ;;  %v621_v27 = vpop.f32.mrf.mxu1 }
 0x105   :  { %1121 = vst.msk [vmem:[%s2047_s4 + $0x64] sm:$0xf] %vm1095_vm2, %v1319_v13  ;;  %v1324_v23 = vpack.c.bf16 %v805_v14, %v805_v14  ;;  %v803_v24 = vmax.f32 %v739_v15, 0.0  ;;  %v742_v25 = vadd.f32 %v1657_v36, %v671_v16  ;;  %v669_v26 = vmul.f32 %v1652_v34, %v493_v22 }
 0x106   :  { %1153 = vst.msk [vmem:[%s2047_s4 + $0xe4] sm:$0xf] %vm1095_vm2, %v1351_v18  ;;  %v1356_v28 = vpack.c.bf16 %v837_v19, %v837_v19  ;;  %v835_v29 = vmax.f32 %v771_v20, 0.0  ;;  %v774_v30 = vadd.f32 %v1657_v36, %v703_v21  ;;  %v701_v31 = vmul.f32 %v1652_v34, %v621_v27 }
 0x107   :  { %1126 = vst.msk [vmem:[%s2047_s4 + $0x78] sm:$0xf] %vm1095_vm2, %v1324_v23  ;;  %v1322_v32 = vpack.c.bf16 %v803_v24, %v803_v24  ;;  %v806_v33 = vmax.f32 %v742_v25, 0.0  ;;  %v740_v35 = vadd.f32 %v1657_v36, %v669_v26 }
 0x108   :  { %1158 = vst.msk [vmem:[%s2047_s4 + $0xf8] sm:$0xf] %vm1095_vm2, %v1356_v28  ;;  %v1354_v37 = vpack.c.bf16 %v835_v29, %v835_v29  ;;  %v838_v38 = vmax.f32 %v774_v30, 0.0  ;;  %v772_v39 = vadd.f32 %v1657_v36, %v701_v31 }
 0x109   :  { %1124 = vst.msk [vmem:[%s2047_s4 + $0x70] sm:$0xf] %vm1095_vm2, %v1322_v32  ;;  %v1325_v34 = vpack.c.bf16 %v806_v33, %v806_v33  ;;  %v804_v40 = vmax.f32 %v740_v35, 0.0 }
 0x10a   :  { %1156 = vst.msk [vmem:[%s2047_s4 + $0xf0] sm:$0xf] %vm1095_vm2, %v1354_v37  ;;  %v1357_v41 = vpack.c.bf16 %v838_v38, %v838_v38  ;;  %v836_v42 = vmax.f32 %v772_v39, 0.0 }
 0x10b   :  { %1127 = vst.msk [vmem:[%s2047_s4 + $0x7c] sm:$0xf] %vm1095_vm2, %v1325_v34  ;;  %v1323_v36 = vpack.c.bf16 %v804_v40, %v804_v40 }
 0x10c   :  { %1159 = vst.msk [vmem:[%s2047_s4 + $0xfc] sm:$0xf] %vm1095_vm2, %v1357_v41  ;;  %v1355_v43 = vpack.c.bf16 %v836_v42, %v836_v42 }
 0x10d   :  { %1125 = vst.msk [vmem:[%s2047_s4 + $0x74] sm:$0xf] %vm1095_vm2, %v1323_v36 }
 0x10e   :  { %1157 = vst.msk [vmem:[%s2047_s4 + $0xf4] sm:$0xf] %vm1095_vm2, %v1355_v43 }

</bundles_post_ra>
